<compile_context>
chip_gen: v7x
topology: tpu7x:2x2x1
jax: 0.10.0
libtpu: 0.0.40
codegen_flags: <defaults>
</compile_context>

<pallas_src>
import jax
import jax.numpy as jnp
from jax.experimental import pallas as pl
from jax.experimental.pallas import tpu as pltpu


# ----------------------------------------------------------------------------- helpers
def _cdiv(a, b):
    return (a + b - 1) // b


def _round_up(x, m):
    return _cdiv(x, m) * m


_VMEM_BUDGET = 20 * 1024 * 1024       # conservative target; v7x has 64 MiB physical VMEM


def _pick_tile_b(B, H, fused, n_table_rows):
    if fused:
        # ids are tiny; bound the in-kernel one-hot intermediates
        # (~tile_b * (NU_pad + NI_pad) bf16) to a few MiB of VMEM.
        tgt = min(8192, (8 << 20) // max(1, 2 * n_table_rows))
    else:
        # >= ~1 MiB of u/i per grid step amortizes the ~0.35 us per-step overhead
        # (128/256-row tiles only reach 29-63% of the HBM roofline).
        tgt = max(2048, (1 << 20) // (2 * H))
        # 2 inputs x 2 pipeline buffers of (tile_b, H) bf16 + the f32 output row must
        # fit alongside the VMEM-resident (H, H) bf16 fc1 weights.
        resident = 2 * 2 * H * H              # W1_u + W1_i
        per_row = 2 * 2 * (2 * H) + 2 * 4     # u/i double-buffered bf16 + f32 out row
        # TODO(synk): for H >= ~2048 the resident fc1 weights alone eat the v7x budget;
        # the right fix there is a K-tiled ("arbitrary") grid axis over H with an f32
        # VMEM accumulator for fc1.
        tgt = min(tgt, max(256, (_VMEM_BUDGET - resident) // per_row))
    if B >= 4096:
        # v7x megacore: keep >= 2 batch tiles so both TensorCores get work.
        tgt = min(tgt, _cdiv(B, 2))
    return _round_up(max(128, min(tgt, B)), 128)


# ----------------------------------------------------------------------------- kernels
def _mlp_tail(u, it, w1u_ref, w1i_ref, b1_ref, w2_ref, b2, o_ref):
    # u, it : (TB, H) bf16.  fc1 split matmuls == concat([u, i], 1) @ W1^T (no concat
    # materialization); bf16 MXU inputs with f32 accumulation.
    h = jnp.dot(u, w1u_ref[...], preferred_element_type=jnp.float32)
    h = h + jnp.dot(it, w1i_ref[...], preferred_element_type=jnp.float32)
    h = jnp.maximum(h + b1_ref[...], 0.0)                        # (TB, H) f32, ReLU

    # fc2 as a bf16 NT matmul: (8, H) . (TB, H)^T -> (8, TB).  Same contraction
    # pattern as q @ k^T in flash attention, which the MXU consumes natively (no
    # materialized XLU transpose of h).  Row 0 is the real logit row (rows 1..7 of
    # the weight slab are zero) and comes out with batch on lanes, so the final
    # store is a dense (1, TB) lane-dense store.
    logits = jax.lax.dot_general(
        w2_ref[...], h.astype(jnp.bfloat16),
        dimension_numbers=(((1,), (1,)), ((), ())),
        preferred_element_type=jnp.float32)                      # (8, TB) f32
    o_ref[0] = jax.nn.sigmoid(logits[0:1, :] + b2)               # dense (1, TB) store


def _mlp_kernel(u_ref, i_ref, w1u_ref, w1i_ref, b1_ref, w2_ref, b2_ref, o_ref):
    # Fallback path: u/i tiles were gathered by XLA and are streamed HBM->VMEM.
    _mlp_tail(u_ref[...], i_ref[...], w1u_ref, w1i_ref, b1_ref, w2_ref,
              b2_ref[0], o_ref)


def _fused_gather_mlp_kernel(uid_ref, iid_ref, utab_ref, itab_ref,
                             w1u_ref, w1i_ref, b1_ref, w2_ref, b2_ref, o_ref):
    # uid/iid : (1, TB, 1) int32 tiles        utab/itab : (NU/NI, H) bf16, VMEM-resident
    tb = uid_ref.shape[1]

    def gather(ids_col, tab_ref):
        n = tab_ref.shape[0]
        # One-hot row-select on the MXU == embedding gather (exact: selects bf16 rows).
        eq = jax.lax.broadcasted_iota(jnp.int32, (tb, n), 1) == ids_col
        onehot = jnp.where(eq, 1.0, 0.0).astype(jnp.bfloat16)
        rows = jnp.dot(onehot, tab_ref[...], preferred_element_type=jnp.float32)
        return rows.astype(jnp.bfloat16)

    u = gather(uid_ref[0], utab_ref)          # (TB, H) bf16
    it = gather(iid_ref[0], itab_ref)         # (TB, H) bf16
    _mlp_tail(u, it, w1u_ref, w1i_ref, b1_ref, w2_ref, b2_ref[0], o_ref)


# ----------------------------------------------------------------------------- wrapper
def centralized_model_forward(user_id, item_id, params):
    """JAX wrapper matching CentralizedModel.forward (temporal/similarity off)."""
    user_tab = params["user_embedding"]          # (num_users, H) bf16
    item_tab = params["item_embedding"]          # (num_items, H) bf16
    w1u = params["fc1_w_u"]                      # (H, H) bf16 == fc1.weight[:, :H].T
    w1i = params["fc1_w_i"]                      # (H, H) bf16 == fc1.weight[:, H:].T
    b1 = params["fc1_b"]                         # (1, H) f32
    w2 = params["fc2_w"]                         # (1, H) bf16 == fc2.weight
    b2 = jnp.reshape(params["fc2_b"], (1,)).astype(jnp.float32)   # (1,) f32 -> SMEM

    num_users, H = user_tab.shape
    num_items = item_tab.shape[0]
    B = user_id.shape[0]

    nu_pad = _round_up(num_users, 8)
    ni_pad = _round_up(num_items, 8)
    # Fused in-kernel gather is a win only while the one-hot row-select stays cheap
    # relative to the u/i HBM round trip it removes (VPU compares ~ (NU+NI)/4096 cyc
    # per row vs ~8*H/1300 cyc per row of saved HBM traffic) and the tables stay
    # VMEM-resident.
    fused = (nu_pad + ni_pad) <= 8 * H and (nu_pad + ni_pad) * H * 2 <= (4 << 20)

    tile_b = _pick_tile_b(B, H, fused, nu_pad + ni_pad)
    B_pad = _round_up(B, tile_b)
    num_tiles = B_pad // tile_b

    user_id = user_id.astype(jnp.int32)
    item_id = item_id.astype(jnp.int32)
    if B_pad != B:
        pad = B_pad - B
        user_id = jnp.concatenate([user_id, jnp.zeros((pad,), jnp.int32)])
        item_id = jnp.concatenate([item_id, jnp.zeros((pad,), jnp.int32)])

    # fc2 weight padded to 8 sublanes so fc2 runs as an aligned NT matmul whose
    # (1, tile_b) result is lane-dense.
    w2_pad = jnp.zeros((8, H), w2.dtype).at[0, :].set(w2.reshape(-1))

    weight_specs = [
        pl.BlockSpec((H, H), lambda b: (0, 0)),        # W1_u     (VMEM-resident)
        pl.BlockSpec((H, H), lambda b: (0, 0)),        # W1_i     (VMEM-resident)
        pl.BlockSpec((1, H), lambda b: (0, 0)),        # b1       (VMEM-resident)
        pl.BlockSpec((8, H), lambda b: (0, 0)),        # W2 slab  (VMEM-resident)
        pl.BlockSpec(memory_space=pltpu.MemorySpace.SMEM),   # b2 scalar (SMEM)
    ]
    out_spec = pl.BlockSpec((1, 1, tile_b), lambda b: (b, 0, 0))
    out_shape = jax.ShapeDtypeStruct((num_tiles, 1, tile_b), jnp.float32)
    cparams = pltpu.CompilerParams(
        dimension_semantics=("parallel",),
        vmem_limit_bytes=32 * 1024 * 1024)

    if fused:
        # Tables are VMEM-resident (constant index_map => DMA'd once); only the tiny
        # int32 id tiles and the (1, tile_b) f32 output move per grid step.
        utab = user_tab if nu_pad == num_users else jnp.pad(
            user_tab, ((0, nu_pad - num_users), (0, 0)))
        itab = item_tab if ni_pad == num_items else jnp.pad(
            item_tab, ((0, ni_pad - num_items), (0, 0)))
        uid3 = user_id.reshape(num_tiles, tile_b, 1)
        iid3 = item_id.reshape(num_tiles, tile_b, 1)
        out = pl.pallas_call(
            _fused_gather_mlp_kernel,
            out_shape=out_shape,
            grid=(num_tiles,),
            in_specs=[
                pl.BlockSpec((1, tile_b, 1), lambda b: (b, 0, 0)),   # user ids
                pl.BlockSpec((1, tile_b, 1), lambda b: (b, 0, 0)),   # item ids
                pl.BlockSpec((nu_pad, H), lambda b: (0, 0)),         # user table (resident)
                pl.BlockSpec((ni_pad, H), lambda b: (0, 0)),         # item table (resident)
            ] + weight_specs,
            out_specs=out_spec,
            compiler_params=cparams,
        )(uid3, iid3, utab, itab, w1u, w1i, b1, w2_pad, b2)
    else:
        # TODO(synk): for large tables this still round-trips u/i through HBM (the
        # dominant traffic).  Fully fusing it needs either Mosaic's dynamic row gather
        # on a VMEM-resident table or a per-row DMA gather (only efficient once a row
        # is >= ~512 B, i.e. H >= 256 in bf16); neither is emitted here.
        u = jnp.take(user_tab, user_id, axis=0)      # (B_pad, H) bf16
        it = jnp.take(item_tab, item_id, axis=0)     # (B_pad, H) bf16
        out = pl.pallas_call(
            _mlp_kernel,
            out_shape=out_shape,
            grid=(num_tiles,),
            in_specs=[
                pl.BlockSpec((tile_b, H), lambda b: (b, 0)),   # u tile (pipelined)
                pl.BlockSpec((tile_b, H), lambda b: (b, 0)),   # i tile (pipelined)
            ] + weight_specs,
            out_specs=out_spec,
            compiler_params=cparams,
        )(u, it, w1u, w1i, b1, w2_pad, b2)

    return out.reshape(-1)[:B]                       # (B,)  == .squeeze(-1)


# ----------------------------------------------------------------------------- params / reference
def init_params(key, hidden_dim, num_items, num_users):
    k = jax.random.split(key, 7)
    s = 0.1
    return {
        "user_embedding": (s * jax.random.normal(k[0], (num_users, hidden_dim))).astype(jnp.bfloat16),
        "item_embedding": (s * jax.random.normal(k[1], (num_items, hidden_dim))).astype(jnp.bfloat16),
        # fc1.weight is (H, 2H) in PyTorch; stored pre-split / pre-transposed:
        #   fc1_w_u == fc1.weight[:, :H].T , fc1_w_i == fc1.weight[:, H:].T
        "fc1_w_u": (s * jax.random.normal(k[2], (hidden_dim, hidden_dim))).astype(jnp.bfloat16),
        "fc1_w_i": (s * jax.random.normal(k[3], (hidden_dim, hidden_dim))).astype(jnp.bfloat16),
        "fc1_b": s * jax.random.normal(k[4], (1, hidden_dim), jnp.float32),
        "fc2_w": (s * jax.random.normal(k[5], (1, hidden_dim))).astype(jnp.bfloat16),
        "fc2_b": s * jax.random.normal(k[6], (1,), jnp.float32),
    }


def _reference_forward(user_id, item_id, params):
    # Pure-JAX f32 reference of the same (bf16-stored) forward.
    with jax.default_matmul_precision("highest"):
        uf = jnp.take(params["user_embedding"].astype(jnp.float32), user_id, axis=0)
        itf = jnp.take(params["item_embedding"].astype(jnp.float32), item_id, axis=0)
        h = jnp.maximum(
            jnp.dot(uf, params["fc1_w_u"].astype(jnp.float32))
            + jnp.dot(itf, params["fc1_w_i"].astype(jnp.float32))
            + params["fc1_b"], 0.0)
        logits = jnp.dot(h, params["fc2_w"].astype(jnp.float32).T) \
            + params["fc2_b"].reshape(1, 1)
        return jax.nn.sigmoid(logits)[:, 0]


# ----------------------------------------------------------------------------- test
if __name__ == "__main__":
    # TODO(synk): temporal (bi-LSTM) and similarity branches are disabled (default
    # constructor flags) — the PyTorch fc1 would shape-mismatch if they were enabled.
    def run_case(hidden_dim, num_users, num_items, batch, key):
        pkey, ukey, ikey = jax.random.split(key, 3)
        params = init_params(pkey, hidden_dim, num_items, num_users)
        user_id = jax.random.randint(ukey, (batch,), 0, num_users, dtype=jnp.int32)
        item_id = jax.random.randint(ikey, (batch,), 0, num_items, dtype=jnp.int32)

        fwd = jax.jit(centralized_model_forward)
        out = jax.block_until_ready(fwd(user_id, item_id, params))
        ref = _reference_forward(user_id, item_id, params)

        assert out.shape == (batch,)
        assert jnp.allclose(out, ref, atol=2e-3, rtol=2e-3), (out, ref)

    key = jax.random.PRNGKey(0)
    k1, k2 = jax.random.split(key)
    # Small tables -> fused in-kernel gather path (tables VMEM-resident).
    run_case(hidden_dim=32, num_users=16, num_items=16, batch=8, key=k1)
    # Larger tables -> XLA-gather fallback path.
    run_case(hidden_dim=32, num_users=200, num_items=300, batch=40, key=k2)
    print("KERNEL_OK")
</pallas_src>

<mosaic_0001>
module attributes {stable_mosaic.version = 11 : i64} {
  func.func @_fused_gather_mlp_kernel(%arg0: i32, %arg1: memref<1x128x1xi32, #tpu.memory_space<vmem>>, %arg2: memref<1x128x1xi32, #tpu.memory_space<vmem>>, %arg3: memref<16x32xbf16, #tpu.memory_space<vmem>>, %arg4: memref<16x32xbf16, #tpu.memory_space<vmem>>, %arg5: memref<32x32xbf16, #tpu.memory_space<vmem>>, %arg6: memref<32x32xbf16, #tpu.memory_space<vmem>>, %arg7: memref<1x32xf32, #tpu.memory_space<vmem>>, %arg8: memref<8x32xbf16, #tpu.memory_space<vmem>>, %arg9: memref<1xf32, #tpu.memory_space<smem>>, %arg10: memref<1x1x128xf32, #tpu.memory_space<vmem>>) attributes {dimension_semantics = [#tpu.dimension_semantics<parallel>], iteration_bounds = array<i64: 1>, scalar_prefetch = 0 : i64, scratch_operands = 0 : i64, tpu.core_type = #tpu.core_type<tc>, window_params = [{transform_indices = @transform_0, window_bounds = array<i64: 1, 128, 1>}, {transform_indices = @transform_1, window_bounds = array<i64: 1, 128, 1>}, {pipeline_mode = #tpu.pipeline_mode<synchronous>, transform_indices = @transform_2, window_bounds = array<i64: 16, 32>}, {pipeline_mode = #tpu.pipeline_mode<synchronous>, transform_indices = @transform_3, window_bounds = array<i64: 16, 32>}, {pipeline_mode = #tpu.pipeline_mode<synchronous>, transform_indices = @transform_4, window_bounds = array<i64: 32, 32>}, {pipeline_mode = #tpu.pipeline_mode<synchronous>, transform_indices = @transform_5, window_bounds = array<i64: 32, 32>}, {pipeline_mode = #tpu.pipeline_mode<synchronous>, transform_indices = @transform_6, window_bounds = array<i64: 1, 32>}, {pipeline_mode = #tpu.pipeline_mode<synchronous>, transform_indices = @transform_7, window_bounds = array<i64: 8, 32>}, {transform_indices = @transform_8, window_bounds = array<i64: 1>}, {transform_indices = @transform_9, window_bounds = array<i64: 1, 1, 128>}]} {
    %c0 = arith.constant 0 : index
    %c0_0 = arith.constant 0 : index
    %c0_1 = arith.constant 0 : index
    %0 = vector.load %arg1[%c0, %c0_0, %c0_1] : memref<1x128x1xi32, #tpu.memory_space<vmem>>, vector<1x128x1xi32>
    %1 = vector.shape_cast %0 : vector<1x128x1xi32> to vector<128x1xi32>
    %2 = tpu.iota {dimensions = array<i32: 1>} : vector<128x16xi32>
    %3 = vector.broadcast %1 : vector<128x1xi32> to vector<128x16xi32>
    %4 = arith.cmpi eq, %2, %3 : vector<128x16xi32>
    %cst = arith.constant 1.000000e+00 : f32
    %cst_2 = arith.constant 0.000000e+00 : f32
    %5 = vector.broadcast %cst : f32 to vector<128x16xf32>
    %6 = vector.broadcast %cst_2 : f32 to vector<128x16xf32>
    %7 = arith.select %4, %5, %6 : vector<128x16xi1>, vector<128x16xf32>
    %8 = arith.truncf %7 : vector<128x16xf32> to vector<128x16xbf16>
    %c0_3 = arith.constant 0 : index
    %c0_4 = arith.constant 0 : index
    %9 = vector.load %arg3[%c0_3, %c0_4] : memref<16x32xbf16, #tpu.memory_space<vmem>>, vector<16x32xbf16>
    %cst_5 = arith.constant dense<0.000000e+00> : vector<128x32xf32>
    %10 = tpu.matmul %8, %9, %cst_5 {dimension_numbers = #tpu.dot_dimension_numbers<[1], [0], [0], [1], [0, 0, 1, 1], [], []>} : vector<128x16xbf16>, vector<16x32xbf16>, vector<128x32xf32> -> vector<128x32xf32>
    %11 = arith.truncf %10 : vector<128x32xf32> to vector<128x32xbf16>
    %c0_6 = arith.constant 0 : index
    %c0_7 = arith.constant 0 : index
    %c0_8 = arith.constant 0 : index
    %12 = vector.load %arg2[%c0_6, %c0_7, %c0_8] : memref<1x128x1xi32, #tpu.memory_space<vmem>>, vector<1x128x1xi32>
    %13 = vector.shape_cast %12 : vector<1x128x1xi32> to vector<128x1xi32>
    %14 = tpu.iota {dimensions = array<i32: 1>} : vector<128x16xi32>
    %15 = vector.broadcast %13 : vector<128x1xi32> to vector<128x16xi32>
    %16 = arith.cmpi eq, %14, %15 : vector<128x16xi32>
    %cst_9 = arith.constant 1.000000e+00 : f32
    %cst_10 = arith.constant 0.000000e+00 : f32
    %17 = vector.broadcast %cst_9 : f32 to vector<128x16xf32>
    %18 = vector.broadcast %cst_10 : f32 to vector<128x16xf32>
    %19 = arith.select %16, %17, %18 : vector<128x16xi1>, vector<128x16xf32>
    %20 = arith.truncf %19 : vector<128x16xf32> to vector<128x16xbf16>
    %c0_11 = arith.constant 0 : index
    %c0_12 = arith.constant 0 : index
    %21 = vector.load %arg4[%c0_11, %c0_12] : memref<16x32xbf16, #tpu.memory_space<vmem>>, vector<16x32xbf16>
    %cst_13 = arith.constant dense<0.000000e+00> : vector<128x32xf32>
    %22 = tpu.matmul %20, %21, %cst_13 {dimension_numbers = #tpu.dot_dimension_numbers<[1], [0], [0], [1], [0, 0, 1, 1], [], []>} : vector<128x16xbf16>, vector<16x32xbf16>, vector<128x32xf32> -> vector<128x32xf32>
    %23 = arith.truncf %22 : vector<128x32xf32> to vector<128x32xbf16>
    %c0_14 = arith.constant 0 : index
    %24 = memref.load %arg9[%c0_14] : memref<1xf32, #tpu.memory_space<smem>>
    %c0_15 = arith.constant 0 : index
    %c0_16 = arith.constant 0 : index
    %25 = vector.load %arg5[%c0_15, %c0_16] : memref<32x32xbf16, #tpu.memory_space<vmem>>, vector<32x32xbf16>
    %cst_17 = arith.constant dense<0.000000e+00> : vector<128x32xf32>
    %26 = tpu.matmul %11, %25, %cst_17 {dimension_numbers = #tpu.dot_dimension_numbers<[1], [0], [0], [1], [0, 0, 1, 1], [], []>} : vector<128x32xbf16>, vector<32x32xbf16>, vector<128x32xf32> -> vector<128x32xf32>
    %c0_18 = arith.constant 0 : index
    %c0_19 = arith.constant 0 : index
    %27 = vector.load %arg6[%c0_18, %c0_19] : memref<32x32xbf16, #tpu.memory_space<vmem>>, vector<32x32xbf16>
    %cst_20 = arith.constant dense<0.000000e+00> : vector<128x32xf32>
    %28 = tpu.matmul %23, %27, %cst_20 {dimension_numbers = #tpu.dot_dimension_numbers<[1], [0], [0], [1], [0, 0, 1, 1], [], []>} : vector<128x32xbf16>, vector<32x32xbf16>, vector<128x32xf32> -> vector<128x32xf32>
    %29 = arith.addf %26, %28 : vector<128x32xf32>
    %c0_21 = arith.constant 0 : index
    %c0_22 = arith.constant 0 : index
    %30 = vector.load %arg7[%c0_21, %c0_22] : memref<1x32xf32, #tpu.memory_space<vmem>>, vector<1x32xf32>
    %31 = vector.broadcast %30 : vector<1x32xf32> to vector<128x32xf32>
    %32 = arith.addf %29, %31 : vector<128x32xf32>
    %cst_23 = arith.constant 0.000000e+00 : f32
    %33 = vector.broadcast %cst_23 : f32 to vector<128x32xf32>
    %34 = arith.maximumf %32, %33 : vector<128x32xf32>
    %c0_24 = arith.constant 0 : index
    %c0_25 = arith.constant 0 : index
    %35 = vector.load %arg8[%c0_24, %c0_25] : memref<8x32xbf16, #tpu.memory_space<vmem>>, vector<8x32xbf16>
    %36 = arith.truncf %34 : vector<128x32xf32> to vector<128x32xbf16>
    %cst_26 = arith.constant dense<0.000000e+00> : vector<8x128xf32>
    %37 = tpu.matmul %35, %36, %cst_26 {dimension_numbers = #tpu.dot_dimension_numbers<[1], [1], [0], [0], [0, 0, 1, 0], [], []>} : vector<8x32xbf16>, vector<128x32xbf16>, vector<8x128xf32> -> vector<8x128xf32>
    %38 = vector.extract_strided_slice %37 {offsets = [0, 0], sizes = [1, 128], strides = [1, 1]} : vector<8x128xf32> to vector<1x128xf32>
    %39 = vector.broadcast %24 : f32 to vector<1x128xf32>
    %40 = arith.addf %38, %39 : vector<1x128xf32>
    %41 = arith.negf %40 : vector<1x128xf32>
    %42 = math.exp %41 : vector<1x128xf32>
    %cst_27 = arith.constant 1.000000e+00 : f32
    %43 = vector.broadcast %cst_27 : f32 to vector<1x128xf32>
    %44 = arith.addf %43, %42 : vector<1x128xf32>
    %45 = arith.divf %43, %44 : vector<1x128xf32>
    %c0_28 = arith.constant 0 : index
    %c0_29 = arith.constant 0 : index
    %c0_30 = arith.constant 0 : index
    %46 = vector.load %arg10[%c0_28, %c0_29, %c0_30] : memref<1x1x128xf32, #tpu.memory_space<vmem>>, vector<1x1x128xf32>
    %47 = vector.shape_cast %46 : vector<1x1x128xf32> to vector<1x128xf32>
    %48 = vector.shape_cast %45 : vector<1x128xf32> to vector<1x1x128xf32>
    tpu.vector_store %arg10[%c0_28, %c0_29, %c0_30], %48 {strides = array<i32>} : memref<1x1x128xf32, #tpu.memory_space<vmem>>, vector<1x1x128xf32>,
    return
  }
  func.func @transform_0(%arg0: i32) -> (i32, i32, i32) {
    %c0_i32 = arith.constant 0 : i32
    %c0_i32_0 = arith.constant 0 : i32
    %c0_i32_1 = arith.constant 0 : i32
    return %arg0, %c0_i32, %c0_i32_0 : i32, i32, i32
  }
  func.func @transform_1(%arg0: i32) -> (i32, i32, i32) {
    %c0_i32 = arith.constant 0 : i32
    %c0_i32_0 = arith.constant 0 : i32
    %c0_i32_1 = arith.constant 0 : i32
    return %arg0, %c0_i32, %c0_i32_0 : i32, i32, i32
  }
  func.func @transform_2(%arg0: i32) -> (i32, i32) {
    %c0_i32 = arith.constant 0 : i32
    %c0_i32_0 = arith.constant 0 : i32
    %c0_i32_1 = arith.constant 0 : i32
    return %c0_i32, %c0_i32_0 : i32, i32
  }
  func.func @transform_3(%arg0: i32) -> (i32, i32) {
    %c0_i32 = arith.constant 0 : i32
    %c0_i32_0 = arith.constant 0 : i32
    %c0_i32_1 = arith.constant 0 : i32
    return %c0_i32, %c0_i32_0 : i32, i32
  }
  func.func @transform_4(%arg0: i32) -> (i32, i32) {
    %c0_i32 = arith.constant 0 : i32
    %c0_i32_0 = arith.constant 0 : i32
    %c0_i32_1 = arith.constant 0 : i32
    return %c0_i32, %c0_i32_0 : i32, i32
  }
  func.func @transform_5(%arg0: i32) -> (i32, i32) {
    %c0_i32 = arith.constant 0 : i32
    %c0_i32_0 = arith.constant 0 : i32
    %c0_i32_1 = arith.constant 0 : i32
    return %c0_i32, %c0_i32_0 : i32, i32
  }
  func.func @transform_6(%arg0: i32) -> (i32, i32) {
    %c0_i32 = arith.constant 0 : i32
    %c0_i32_0 = arith.constant 0 : i32
    %c0_i32_1 = arith.constant 0 : i32
    return %c0_i32, %c0_i32_0 : i32, i32
  }
  func.func @transform_7(%arg0: i32) -> (i32, i32) {
    %c0_i32 = arith.constant 0 : i32
    %c0_i32_0 = arith.constant 0 : i32
    %c0_i32_1 = arith.constant 0 : i32
    return %c0_i32, %c0_i32_0 : i32, i32
  }
  func.func @transform_8(%arg0: i32) -> i32 {
    %c0_i32 = arith.constant 0 : i32
    %c0_i32_0 = arith.constant 0 : i32
    return %c0_i32 : i32
  }
  func.func @transform_9(%arg0: i32) -> (i32, i32, i32) {
    %c0_i32 = arith.constant 0 : i32
    %c0_i32_0 = arith.constant 0 : i32
    %c0_i32_1 = arith.constant 0 : i32
    return %arg0, %c0_i32, %c0_i32_0 : i32, i32, i32
  }
}

</mosaic_0001>

<bundles_post_ra>
// kernel: centralized_model_forward.1
= control target key start
LH: loop header
LB: loop body
LE: loop exit
PB: predicated region body
PF: predicated region fallthrough
CT: control target
= control target key end

     0   :  { %v1140_v0 = vmov 0   ;;  %v50_v36 = vlaneseq  ;;  %vm148_vm4 = vcmask 130048   ;;  %v1141_v42 = vmov 0.0   ;;  %s1458_s0 = inlined_call_operand.vmem [shape: s32[1,128,1], index: 0, kind: input, shape index: {}]   ;;  %s1459_s1 = inlined_call_operand.vmem [shape: s32[1,128,1], index: 1, kind: input, shape index: {}]   ;;  %s1460_s2 = inlined_call_operand.vmem [shape: bf16[16,32], index: 2, kind: input, shape index: {}]   ;;  %s1461_s3 = inlined_call_operand.vmem [shape: bf16[16,32], index: 3, kind: input, shape index: {}]   ;;  %s1462_s5 = inlined_call_operand.vmem [shape: bf16[32,32], index: 5, kind: input, shape index: {}]   ;;  %s1463_s4 = inlined_call_operand.vmem [shape: bf16[32,32], index: 4, kind: input, shape index: {}]   ;;  %s1464_s6 = inlined_call_operand.vmem [shape: f32[1,32], index: 6, kind: input, shape index: {}]   ;;  %s1465_s7 = inlined_call_operand.vmem [shape: bf16[8,32], index: 7, kind: input, shape index: {}]   ;;  %s1466_s8 = inlined_call_operand.<no memory space> [shape: f32[1], index: 8, kind: input, shape index: {}]   ;;  %s1467_s9 = inlined_call_operand.vmem [shape: f32[1,1,128], index: 9, kind: output, shape index: {}]  }
   0x1   :  { %1129 = vset.pattern.permute.xlu1 %v1140_v0  ;;  %1128 = vset.pattern.permute.xlu0 %v1140_v0  ;;  %v48_v1 = vld [vmem:[%s1458_s0 + $0x70] sm:$0xff]  ;;  %v46_v2 = vld [vmem:[%s1458_s0 + $0x60] sm:$0xff]  ;;  %v49_v3 = vld [vmem:[%s1458_s0 + $0x78] sm:$0xff] }
   0x2   :  { %95 = vperm.xlu1 %1129, %v48_v1   ;;  %89 = vperm.xlu0 %1128, %v46_v2   ;;  %v47_v4 = vld [vmem:[%s1458_s0 + $0x68] sm:$0xff]  ;;  %v278_v6 = vld [vmem:[%s1459_s1] sm:$0xff]  ;;  %v281_v7 = vld [vmem:[%s1459_s1 + $0x18] sm:$0xff]  ;;  %v1304_v37 = vand.u32 127, %v50_v36 }
   0x3   :  { %v279_v5 = vld [vmem:[%s1459_s1 + $0x8] sm:$0xff]  ;;  %v280_v8 = vld [vmem:[%s1459_s1 + $0x10] sm:$0xff]  ;;  %v1130_v9 = vld [vmem:[%s1460_s2] sm:$0xff]  }
   0x4   :  { %v1223_v10 = vld [vmem:[%s1461_s3] sm:$0xff]   ;;  %v283_v11 = vld [vmem:[%s1459_s1 + $0x28] sm:$0xff]  ;;  %1107 = vmatprep.subr.bf16.mxu1 %v1130_v9  ;;  %1011 = vmatprep.subr.bf16.mxu0 %v1130_v9  ;;  %v285_v13 = vld [vmem:[%s1459_s1 + $0x38] sm:$0xff] }
   0x5   :  { %v282_v12 = vld [vmem:[%s1459_s1 + $0x20] sm:$0xff]  ;;  %1108 = vmatpush3.bf16.msra.mxu1 %v1130_v9  ;;  %1012 = vmatpush3.bf16.msra.mxu0 %v1130_v9  ;;  %v284_v14 = vld [vmem:[%s1459_s1 + $0x30] sm:$0xff]  ;;  %v287_v15 = vld [vmem:[%s1459_s1 + $0x48] sm:$0xff] }
   0x6   :  { %98 = vperm.xlu1 %1129, %v49_v3   ;;  %92 = vperm.xlu0 %1128, %v47_v4   ;;  %v286_v16 = vld [vmem:[%s1459_s1 + $0x40] sm:$0xff]  ;;  %v289_v17 = vld [vmem:[%s1459_s1 + $0x58] sm:$0xff]  ;;  %v288_v18 = vld [vmem:[%s1459_s1 + $0x50] sm:$0xff] }
   0x7   :  { %1029 = vmatprep.subr.bf16.mxu1 %v1223_v10  ;;  %v291_v19 = vld [vmem:[%s1459_s1 + $0x68] sm:$0xff]  ;;  %v290_v20 = vld [vmem:[%s1459_s1 + $0x60] sm:$0xff]  ;;  %v293_v21 = vld [vmem:[%s1459_s1 + $0x78] sm:$0xff] }
   0x8   :  { %v292_v22 = vld [vmem:[%s1459_s1 + $0x70] sm:$0xff]  ;;  %v35_v23 = vld [vmem:[%s1458_s0 + $0x8] sm:$0xff]  ;;  %v34_v24 = vld [vmem:[%s1458_s0] sm:$0xff] }
   0x9   :  { %v37_v25 = vld [vmem:[%s1458_s0 + $0x18] sm:$0xff]  ;;  %v36_v26 = vld [vmem:[%s1458_s0 + $0x10] sm:$0xff]  ;;  %v39_v27 = vld [vmem:[%s1458_s0 + $0x28] sm:$0xff] }
   0xa   :  { %298 = vperm.xlu1 %1129, %v279_v5   ;;  %295 = vperm.xlu0 %1128, %v278_v6   ;;  %v38_v28 = vld [vmem:[%s1458_s0 + $0x20] sm:$0xff]  ;;  %v41_v29 = vld [vmem:[%s1458_s0 + $0x38] sm:$0xff]  ;;  %v40_v30 = vld [vmem:[%s1458_s0 + $0x30] sm:$0xff] }
   0xb   :  { %v43_v31 = vld [vmem:[%s1458_s0 + $0x48] sm:$0xff]  ;;  %v42_v32 = vld [vmem:[%s1458_s0 + $0x40] sm:$0xff]  ;;  %v45_v33 = vld [vmem:[%s1458_s0 + $0x58] sm:$0xff] }
   0xc   :  { %v44_v34 = vld [vmem:[%s1458_s0 + $0x50] sm:$0xff]  ;;  %v1301_v35 = vld [vmem:[%s1462_s5] sm:$0xff]  }
   0xd   :  { %1047 = vmatprep.subr.bf16.mxu0 %v1301_v35 }
   0xe   :  { %304 = vperm.xlu1 %1129, %v281_v7   ;;  %301 = vperm.xlu0 %1128, %v280_v8  }
  0x12   :  { %310 = vperm.xlu1 %1129, %v283_v11   ;;  %307 = vperm.xlu0 %1128, %v282_v12  }
  0x16   :  { %316 = vperm.xlu1 %1129, %v285_v13   ;;  %313 = vperm.xlu0 %1128, %v284_v14  }
  0x1a   :  { %322 = vperm.xlu1 %1129, %v287_v15   ;;  %319 = vperm.xlu0 %1128, %v286_v16  }
  0x1e   :  { %328 = vperm.xlu1 %1129, %v289_v17   ;;  %325 = vperm.xlu0 %1128, %v288_v18  }
  0x22   :  { %334 = vperm.xlu1 %1129, %v291_v19   ;;  %331 = vperm.xlu0 %1128, %v290_v20  }
  0x26   :  { %340 = vperm.xlu1 %1129, %v293_v21   ;;  %337 = vperm.xlu0 %1128, %v292_v22  }
  0x2a   :  { %56 = vperm.xlu1 %1129, %v35_v23   ;;  %53 = vperm.xlu0 %1128, %v34_v24  }
  0x2e   :  { %62 = vperm.xlu1 %1129, %v37_v25   ;;  %59 = vperm.xlu0 %1128, %v36_v26  }
  0x32   :  { %68 = vperm.xlu1 %1129, %v39_v27   ;;  %65 = vperm.xlu0 %1128, %v38_v28  }
  0x36   :  { %74 = vperm.xlu1 %1129, %v41_v29   ;;  %71 = vperm.xlu0 %1128, %v40_v30  }
  0x3a   :  { %80 = vperm.xlu1 %1129, %v43_v31   ;;  %77 = vperm.xlu0 %1128, %v42_v32  }
  0x3e   :  { %86 = vperm.xlu1 %1129, %v45_v33   ;;  %83 = vperm.xlu0 %1128, %v44_v34  }
  0x81   :  { %v96_v38 = vpop.permute.xlu1 %95  ;;  %v90_v39 = vpop.permute.xlu0 %89 }
  0x82   :  { %vm114_vm0 = vcmp.eq.s32.totalorder %v1304_v37, %v96_v38  ;;  %vm112_vm1 = vcmp.eq.s32.totalorder %v1304_v37, %v90_v39 }
  0x83   :  { %v130_v43 = vsel %vm114_vm0, 1.0, %v1141_v42  ;;  %v128_v44 = vsel %vm112_vm1, 1.0, %v1141_v42 }
  0x85   :  { %v99_v40 = vpop.permute.xlu1 %98  ;;  %v93_v41 = vpop.permute.xlu0 %92 }
  0x86   :  { %vm115_vm2 = vcmp.eq.s32.totalorder %v1304_v37, %v99_v40  ;;  %vm113_vm3 = vcmp.eq.s32.totalorder %v1304_v37, %v93_v41 }
  0x87   :  { %v131_v45 = vsel %vm115_vm2, 1.0, %v1141_v42  ;;  %v129_v46 = vsel %vm113_vm3, 1.0, %v1141_v42 }
  0x88   :  { %v139_v47 = vpack.c.bf16 %v131_v45, %v130_v43  ;;  %v138_v48 = vpack.c.bf16 %v129_v46, %v128_v44 }
  0x89   :  { %v299_v49 = vpop.permute.xlu1 %298  ;;  %v296_v50 = vpop.permute.xlu0 %295 }
  0x8a   :  { %vm343_vm5 = vcmp.eq.s32.totalorder %v1304_v37, %v299_v49  ;;  %vm342_vm6 = vcmp.eq.s32.totalorder %v1304_v37, %v296_v50  ;;  %1025 = vmatprep.mubr.msk.bf16.mxu1 %vm148_vm4, %v138_v48 }
  0x8b   :  { %v359_v51 = vsel %vm343_vm5, 1.0, %v1141_v42  ;;  %v358_v52 = vsel %vm342_vm6, 1.0, %v1141_v42  ;;  %1026 = vmatmul.mubr.msk.bf16.vlgmr.msra.gmra.mrb[0].mxu1 %vm148_vm4, %v139_v47 }
  0x8c   :  { %v374_v53 = vpack.c.bf16 %v359_v51, %v358_v52  ;;  %1030 = vmatpush3.bf16.msra.mxu1 %v1223_v10 }
  0x8d   :  { %v305_v54 = vpop.permute.xlu1 %304  ;;  %v302_v55 = vpop.permute.xlu0 %301  ;;  %1087 = vmatprep.subr.bf16.mxu1 %v1141_v42 }
  0x8e   :  { %vm345_vm7 = vcmp.eq.s32.totalorder %v1304_v37, %v305_v54  ;;  %vm344_vm8 = vcmp.eq.s32.totalorder %v1304_v37, %v302_v55  ;;  %1031 = vmatprep.mubr.msk.bf16.mxu1 %vm148_vm4, %v374_v53 }
  0x8f   :  { %v361_v56 = vsel %vm345_vm7, 1.0, %v1141_v42  ;;  %v360_v57 = vsel %vm344_vm8, 1.0, %v1141_v42 }
  0x90   :  { %v375_v58 = vpack.c.bf16 %v361_v56, %v360_v57  ;;  %v1133_v57 = vld [vmem:[%s1462_s5 + $0x8] sm:$0xff]  }
  0x91   :  { %v311_v59 = vpop.permute.xlu1 %310  ;;  %v308_v60 = vpop.permute.xlu0 %307 }
  0x92   :  { %vm347_vm9 = vcmp.eq.s32.totalorder %v1304_v37, %v311_v59  ;;  %vm346_vm10 = vcmp.eq.s32.totalorder %v1304_v37, %v308_v60 }
  0x93   :  { %v363_v61 = vsel %vm347_vm9, 1.0, %v1141_v42  ;;  %v362_v62 = vsel %vm346_vm10, 1.0, %v1141_v42  ;;  %1032 = vmatmul.mubr.msk.bf16.vlgmr.msra.gmra.mrb[4].mxu1 %vm148_vm4, %v375_v58  ;;  %v1134_v58 = vld [vmem:[%s1463_s4] sm:$0xff]  }
  0x94   :  { %v376_v63 = vpack.c.bf16 %v363_v61, %v362_v62 }
  0x95   :  { %v317_v0 = vpop.permute.xlu1 %316  ;;  %v314_v1 = vpop.permute.xlu0 %313 }
  0x96   :  { %vm349_vm11 = vcmp.eq.s32.totalorder %v1304_v37, %v317_v0  ;;  %vm348_vm12 = vcmp.eq.s32.totalorder %v1304_v37, %v314_v1  ;;  %1035 = vmatprep.mubr.msk.bf16.mxu1 %vm148_vm4, %v376_v63 }
  0x97   :  { %v365_v2 = vsel %vm349_vm11, 1.0, %v1141_v42  ;;  %v364_v3 = vsel %vm348_vm12, 1.0, %v1141_v42 }
  0x98   :  { %v377_v4 = vpack.c.bf16 %v365_v2, %v364_v3 }
  0x99   :  { %v323_v5 = vpop.permute.xlu1 %322  ;;  %v320_v6 = vpop.permute.xlu0 %319 }
  0x9a   :  { %vm351_vm13 = vcmp.eq.s32.totalorder %v1304_v37, %v323_v5  ;;  %vm350_vm14 = vcmp.eq.s32.totalorder %v1304_v37, %v320_v6  ;;  %v1135_v6 = vld [vmem:[%s1463_s4 + $0x8] sm:$0xff]  }
  0x9b   :  { %v367_v7 = vsel %vm351_vm13, 1.0, %v1141_v42  ;;  %v366_v8 = vsel %vm350_vm14, 1.0, %v1141_v42  ;;  %1036 = vmatmul.mubr.msk.bf16.gmra.mrb[8].mxu1 %vm148_vm4, %v377_v4 }
  0x9c   :  { %v378_v9 = vpack.c.bf16 %v367_v7, %v366_v8 }
  0x9d   :  { %v329_v10 = vpop.permute.xlu1 %328  ;;  %v326_v11 = vpop.permute.xlu0 %325 }
  0x9e   :  { %vm353_vm15 = vcmp.eq.s32.totalorder %v1304_v37, %v329_v10  ;;  %vm352_vm0 = vcmp.eq.s32.totalorder %v1304_v37, %v326_v11  ;;  %1039 = vmatprep.mubr.msk.bf16.mxu1 %vm148_vm4, %v378_v9 }
  0x9f   :  { %v369_v12 = vsel %vm353_vm15, 1.0, %v1141_v42  ;;  %v368_v13 = vsel %vm352_vm0, 1.0, %v1141_v42 }
  0xa0   :  { %v379_v14 = vpack.c.bf16 %v369_v12, %v368_v13 }
  0xa1   :  { %v335_v15 = vpop.permute.xlu1 %334  ;;  %v332_v16 = vpop.permute.xlu0 %331 }
  0xa2   :  { %vm355_vm1 = vcmp.eq.s32.totalorder %v1304_v37, %v335_v15  ;;  %vm354_vm2 = vcmp.eq.s32.totalorder %v1304_v37, %v332_v16 }
  0xa3   :  { %v371_v17 = vsel %vm355_vm1, 1.0, %v1141_v42  ;;  %v370_v18 = vsel %vm354_vm2, 1.0, %v1141_v42  ;;  %1040 = vmatmul.mubr.msk.bf16.gmra.mrb[12].mxu1 %vm148_vm4, %v379_v14  ;;  %vm1142_vm2 = vmmov 0  }
  0xa4   :  { %v380_v19 = vpack.c.bf16 %v371_v17, %v370_v18 }
  0xa5   :  { %v341_v20 = vpop.permute.xlu1 %340  ;;  %v338_v21 = vpop.permute.xlu0 %337 }
  0xa6   :  { %vm357_vm3 = vcmp.eq.s32.totalorder %v1304_v37, %v341_v20  ;;  %vm356_vm5 = vcmp.eq.s32.totalorder %v1304_v37, %v338_v21  ;;  %1043 = vmatprep.mubr.msk.bf16.mxu1 %vm148_vm4, %v380_v19 }
  0xa7   :  { %v373_v22 = vsel %vm357_vm3, 1.0, %v1141_v42  ;;  %v372_v23 = vsel %vm356_vm5, 1.0, %v1141_v42 }
  0xa8   :  { %v381_v24 = vpack.c.bf16 %v373_v22, %v372_v23 }
  0xa9   :  { %v57_v25 = vpop.permute.xlu1 %56  ;;  %v54_v26 = vpop.permute.xlu0 %53 }
  0xaa   :  { %vm101_vm6 = vcmp.eq.s32.totalorder %v1304_v37, %v57_v25  ;;  %vm100_vm7 = vcmp.eq.s32.totalorder %v1304_v37, %v54_v26 }
  0xab   :  { %v117_v27 = vsel %vm101_vm6, 1.0, %v1141_v42  ;;  %v116_v28 = vsel %vm100_vm7, 1.0, %v1141_v42  ;;  %1044 = vmatmul.mubr.msk.bf16.gmra.mrb[16].mxu1 %vm148_vm4, %v381_v24 }
  0xac   :  { %v132_v29 = vpack.c.bf16 %v117_v27, %v116_v28  ;;  %1103 = vmatprep.mubr.msk.bf16.mxu1 %vm1142_vm2, %v1141_v42 }
  0xad   :  { %v63_v30 = vpop.permute.xlu1 %62  ;;  %v60_v31 = vpop.permute.xlu0 %59 }
  0xae   :  { %vm103_vm8 = vcmp.eq.s32.totalorder %v1304_v37, %v63_v30  ;;  %vm102_vm9 = vcmp.eq.s32.totalorder %v1304_v37, %v60_v31  ;;  %1013 = vmatprep.mubr.msk.bf16.mxu0 %vm148_vm4, %v132_v29 }
  0xaf   :  { %v119_v32 = vsel %vm103_vm8, 1.0, %v1141_v42  ;;  %v118_v33 = vsel %vm102_vm9, 1.0, %v1141_v42 }
  0xb0   :  { %v133_v34 = vpack.c.bf16 %v119_v32, %v118_v33 }
  0xb1   :  { %v69_v36 = vpop.permute.xlu1 %68  ;;  %v66_v38 = vpop.permute.xlu0 %65 }
  0xb2   :  { %vm105_vm10 = vcmp.eq.s32.totalorder %v1304_v37, %v69_v36  ;;  %vm104_vm11 = vcmp.eq.s32.totalorder %v1304_v37, %v66_v38  ;;  %1014 = vmatmul.mubr.msk.bf16.vlgmr.msra.gmra.mrb[0].mxu0 %vm148_vm4, %v133_v34 }
  0xb3   :  { %v121_v39 = vsel %vm105_vm10, 1.0, %v1141_v42  ;;  %v120_v40 = vsel %vm104_vm11, 1.0, %v1141_v42  ;;  %1048 = vmatpush3.bf16.msra.mxu0 %v1301_v35 }
  0xb4   :  { %v134_v41 = vpack.c.bf16 %v121_v39, %v120_v40  ;;  %1049 = vmatprep.subr.bf16.mxu0 %v1133_v57 }
  0xb5   :  { %v75_v43 = vpop.permute.xlu1 %74  ;;  %v72_v44 = vpop.permute.xlu0 %71 }
  0xb6   :  { %vm107_vm12 = vcmp.eq.s32.totalorder %v1304_v37, %v75_v43  ;;  %vm106_vm13 = vcmp.eq.s32.totalorder %v1304_v37, %v72_v44  ;;  %1017 = vmatprep.mubr.msk.bf16.mxu0 %vm148_vm4, %v134_v41 }
  0xb7   :  { %v123_v45 = vsel %vm107_vm12, 1.0, %v1141_v42  ;;  %v122_v46 = vsel %vm106_vm13, 1.0, %v1141_v42  ;;  %1050 = vmatpush3.bf16.msra.mxu0 %v1133_v57 }
  0xb8   :  { %v135_v47 = vpack.c.bf16 %v123_v45, %v122_v46  ;;  %1067 = vmatprep.subr.bf16.mxu0 %v1134_v58  ;;  %v961_v46 = vld [vmem:[%s1464_s6] ss:$0 sm:$0xff] }
  0xb9   :  { %v81_v48 = vpop.permute.xlu1 %80  ;;  %v78_v49 = vpop.permute.xlu0 %77 }
  0xba   :  { %vm109_vm14 = vcmp.eq.s32.totalorder %v1304_v37, %v81_v48  ;;  %vm108_vm15 = vcmp.eq.s32.totalorder %v1304_v37, %v78_v49  ;;  %1018 = vmatmul.mubr.msk.bf16.gmra.mrb[4].mxu0 %vm148_vm4, %v135_v47 }
  0xbb   :  { %v125_v35 = vsel %vm109_vm14, 1.0, %v1141_v42  ;;  %v124_v50 = vsel %vm108_vm15, 1.0, %v1141_v42 }
  0xbc   :  { %v136_v51 = vpack.c.bf16 %v125_v35, %v124_v50 }
  0xbd   :  { %v87_v52 = vpop.permute.xlu1 %86  ;;  %v84_v53 = vpop.permute.xlu0 %83 }
  0xbe   :  { %vm111_vm0 = vcmp.eq.s32.totalorder %v1304_v37, %v87_v52  ;;  %vm110_vm1 = vcmp.eq.s32.totalorder %v1304_v37, %v84_v53  ;;  %1021 = vmatprep.mubr.msk.bf16.mxu0 %vm148_vm4, %v136_v51 }
  0xbf   :  { %v127_v54 = vsel %vm111_vm0, 1.0, %v1141_v42  ;;  %v126_v55 = vsel %vm110_vm1, 1.0, %v1141_v42 }
  0xc0   :  { %v137_v56 = vpack.c.bf16 %v127_v54, %v126_v55 }
  0xc2   :  { %1022 = vmatmul.mubr.msk.bf16.gmra.mrb[8].mxu0 %vm148_vm4, %v137_v56  ;;  %vm540_vm4 = vcmask 261120  }
 0x15e   :  { %v1395_v37 = vpop.f32.mrb[0].mxu1 }
 0x15f   :  { %v1397_v59 = vpop.f32.mrb[1].mxu1 }
 0x160   :  { %v1399_v60 = vpop.f32.mrb[2].mxu1 }
 0x161   :  { %v277_v61 = vpack.c.bf16 %v1399_v60, %v1395_v37  ;;  %v1403_v62 = vpop.f32.mrb[3].mxu1 }
 0x162   :  { %v276_v63 = vpack.c.bf16 %v1403_v62, %v1397_v59 }
 0x166   :  { %v1033_v0 = vpop.f32.mrb[4].mxu1 }
 0x167   :  { %v448_v1 = vpop.f32.mrb[5].mxu1 }
 0x168   :  { %v1034_v2 = vpop.f32.mrb[6].mxu1 }
 0x169   :  { %v512_v3 = vpack.c.bf16 %v1034_v2, %v1033_v0  ;;  %v451_v4 = vpop.f32.mrb[7].mxu1 }
 0x16a   :  { %v511_v5 = vpack.c.bf16 %v451_v4, %v448_v1 }
 0x16c   :  { %1051 = vmatprep.mubr.msk.bf16.mxu0 %vm540_vm4, %v511_v5 }
 0x16d   :  { %1052 = vmatmul.mubr.msk.bf16.vlgmr.msra.gmra.mrb[12].mxu0 %vm540_vm4, %v512_v3 }
 0x16e   :  { %1068 = vmatpush3.bf16.msra.mxu0 %v1134_v58  ;;  %v1037_v7 = vpop.f32.mrb[8].mxu1 }
 0x16f   :  { %v464_v8 = vpop.f32.mrb[9].mxu1  ;;  %1069 = vmatprep.subr.bf16.mxu0 %v1135_v6 }
 0x170   :  { %v1038_v9 = vpop.f32.mrb[10].mxu1 }
 0x171   :  { %v514_v10 = vpack.c.bf16 %v1038_v9, %v1037_v7  ;;  %v467_v11 = vpop.f32.mrb[11].mxu1 }
 0x172   :  { %v513_v12 = vpack.c.bf16 %v467_v11, %v464_v8  ;;  %1070 = vmatpush3.bf16.msra.mxu0 %v1135_v6 }
 0x174   :  { %1055 = vmatprep.mubr.msk.bf16.mxu0 %vm540_vm4, %v513_v12 }
 0x175   :  { %1056 = vmatmul.mubr.msk.bf16.gmra.mrb[16].mxu0 %vm540_vm4, %v514_v10 }
 0x176   :  { %v1041_v13 = vpop.f32.mrb[12].mxu1 }
 0x177   :  { %v480_v14 = vpop.f32.mrb[13].mxu1 }
 0x178   :  { %v1042_v15 = vpop.f32.mrb[14].mxu1 }
 0x179   :  { %v516_v16 = vpack.c.bf16 %v1042_v15, %v1041_v13  ;;  %v483_v17 = vpop.f32.mrb[15].mxu1 }
 0x17a   :  { %v515_v18 = vpack.c.bf16 %v483_v17, %v480_v14 }
 0x17c   :  { %1059 = vmatprep.mubr.msk.bf16.mxu0 %vm540_vm4, %v515_v18 }
 0x17d   :  { %1060 = vmatmul.mubr.msk.bf16.gmra.mrb[20].mxu0 %vm540_vm4, %v516_v16 }
 0x17e   :  { %v1045_v19 = vpop.f32.mrb[16].mxu1 }
 0x17f   :  { %v496_v20 = vpop.f32.mrb[17].mxu1 }
 0x180   :  { %v1046_v21 = vpop.f32.mrb[18].mxu1 }
 0x181   :  { %v518_v22 = vpack.c.bf16 %v1046_v21, %v1045_v19  ;;  %v499_v23 = vpop.f32.mrb[19].mxu1 }
 0x182   :  { %v517_v24 = vpack.c.bf16 %v499_v23, %v496_v20 }
 0x184   :  { %1063 = vmatprep.mubr.msk.bf16.mxu0 %vm540_vm4, %v517_v24 }
 0x185   :  { %v1015_v25 = vpop.f32.mrb[0].mxu0  ;;  %1064 = vmatmul.mubr.msk.bf16.gmra.mrb[24].mxu0 %vm540_vm4, %v518_v22 }
 0x186   :  { %v207_v26 = vpop.f32.mrb[1].mxu0 }
 0x187   :  { %v1016_v27 = vpop.f32.mrb[2].mxu0 }
 0x188   :  { %v271_v28 = vpack.c.bf16 %v1016_v27, %v1015_v25  ;;  %v210_v29 = vpop.f32.mrb[3].mxu0 }
 0x189   :  { %v270_v30 = vpack.c.bf16 %v210_v29, %v207_v26 }
 0x18b   :  { %1071 = vmatprep.mubr.msk.bf16.mxu0 %vm540_vm4, %v270_v30 }
 0x18d   :  { %v1019_v31 = vpop.f32.mrb[4].mxu0  ;;  %1072 = vmatmul.mubr.msk.bf16.vlgmr.msra.gmra.mrb[12].mxu0 %vm540_vm4, %v271_v28 }
 0x18e   :  { %v223_v32 = vpop.f32.mrb[5].mxu0 }
 0x18f   :  { %v1020_v33 = vpop.f32.mrb[6].mxu0 }
 0x190   :  { %v273_v34 = vpack.c.bf16 %v1020_v33, %v1019_v31  ;;  %v226_v36 = vpop.f32.mrb[7].mxu0 }
 0x191   :  { %v272_v38 = vpack.c.bf16 %v226_v36, %v223_v32 }
 0x193   :  { %1075 = vmatprep.mubr.msk.bf16.mxu0 %vm540_vm4, %v272_v38 }
 0x195   :  { %v1023_v39 = vpop.f32.mrb[8].mxu0  ;;  %1076 = vmatmul.mubr.msk.bf16.gmra.mrb[16].mxu0 %vm540_vm4, %v273_v34 }
 0x196   :  { %v239_v40 = vpop.f32.mrb[9].mxu0 }
 0x197   :  { %v1024_v41 = vpop.f32.mrb[10].mxu0 }
 0x198   :  { %v275_v43 = vpack.c.bf16 %v1024_v41, %v1023_v39  ;;  %v242_v44 = vpop.f32.mrb[11].mxu0 }
 0x199   :  { %v274_v45 = vpack.c.bf16 %v242_v44, %v239_v40 }
 0x19b   :  { %1079 = vmatprep.mubr.msk.bf16.mxu0 %vm540_vm4, %v274_v45 }
 0x19d   :  { %1080 = vmatmul.mubr.msk.bf16.gmra.mrb[20].mxu0 %vm540_vm4, %v275_v43 }
 0x19e   :  { %1083 = vmatprep.mubr.msk.bf16.mxu0 %vm540_vm4, %v276_v63 }
 0x1a5   :  { %1084 = vmatmul.mubr.msk.bf16.gmra.mrb[24].mxu0 %vm540_vm4, %v277_v61 }
 0x260   :  { %v1073_v47 = vpop.f32.mrb[12].mxu0 }
 0x261   :  { %v804_v48 = vadd.f32 %v1073_v47, %v961_v46  ;;  %v732_v49 = vpop.f32.mrb[13].mxu0 }
 0x262   :  { %v802_v35 = vadd.f32 %v961_v46, %v732_v49  ;;  %v1074_v50 = vpop.f32.mrb[14].mxu0  ;;  %v910_v49 = vstv %s1466_s8 }
 0x263   :  { %v805_v51 = vadd.f32 %v1074_v50, %v961_v46  ;;  %v735_v52 = vpop.f32.mrb[15].mxu0  ;;  %v820_v54 = vmax.f32 %v804_v48, 0.0  ;;  %v834_v48 = vld [vmem:[%s1465_s7] sm:$0xf] }
 0x264   :  { %v803_v53 = vadd.f32 %v961_v46, %v735_v52  ;;  %v818_v56 = vmax.f32 %v802_v35, 0.0 }
 0x265   :  { %v821_v55 = vmax.f32 %v805_v51, 0.0 }
 0x266   :  { %v819_v57 = vmax.f32 %v803_v53, 0.0 }
 0x267   :  { %v836_v58 = vpack.c.bf16 %v821_v55, %v820_v54 }
 0x268   :  { %v835_v37 = vpack.c.bf16 %v819_v57, %v818_v56  ;;  %v1077_v59 = vpop.f32.mrb[16].mxu0 }
 0x269   :  { %v808_v60 = vadd.f32 %v1077_v59, %v961_v46  ;;  %v748_v61 = vpop.f32.mrb[17].mxu0  ;;  %v850_v15 = vsel %vm540_vm4, %v836_v58, 0 }
 0x26a   :  { %v806_v62 = vadd.f32 %v961_v46, %v748_v61  ;;  %v1078_v63 = vpop.f32.mrb[18].mxu0  ;;  %v847_v0 = vsel %vm540_vm4, %v835_v37, 0 }
 0x26b   :  { %v809_v1 = vadd.f32 %v1078_v63, %v961_v46  ;;  %v751_v2 = vpop.f32.mrb[19].mxu0  ;;  %1088 = vmatpush3.bf16.xpose.msra.mxu1 %v847_v0  ;;  %v824_v4 = vmax.f32 %v808_v60, 0.0 }
 0x26c   :  { %v807_v3 = vadd.f32 %v961_v46, %v751_v2  ;;  %1089 = vmatprep.subr.bf16.mxu1 %v1141_v42  ;;  %v822_v6 = vmax.f32 %v806_v62, 0.0 }
 0x26d   :  { %v825_v5 = vmax.f32 %v809_v1, 0.0 }
 0x26e   :  { %v823_v7 = vmax.f32 %v807_v3, 0.0 }
 0x26f   :  { %v838_v8 = vpack.c.bf16 %v825_v5, %v824_v4 }
 0x270   :  { %v837_v9 = vpack.c.bf16 %v823_v7, %v822_v6  ;;  %v1081_v10 = vpop.f32.mrb[20].mxu0 }
 0x271   :  { %v812_v11 = vadd.f32 %v1081_v10, %v961_v46  ;;  %v764_v12 = vpop.f32.mrb[21].mxu0  ;;  %v856_v43 = vsel %vm540_vm4, %v838_v8, 0 }
 0x272   :  { %v810_v13 = vadd.f32 %v961_v46, %v764_v12  ;;  %v1082_v14 = vpop.f32.mrb[22].mxu0  ;;  %v853_v30 = vsel %vm540_vm4, %v837_v9, 0 }
 0x273   :  { %v813_v16 = vadd.f32 %v1082_v14, %v961_v46  ;;  %v767_v17 = vpop.f32.mrb[23].mxu0  ;;  %1090 = vmatpush3.bf16.xpose.msra.mxu1 %v850_v15  ;;  %v828_v19 = vmax.f32 %v812_v11, 0.0 }
 0x274   :  { %v811_v18 = vadd.f32 %v961_v46, %v767_v17  ;;  %1091 = vmatprep.subr.bf16.mxu1 %v1141_v42  ;;  %v826_v21 = vmax.f32 %v810_v13, 0.0 }
 0x275   :  { %v829_v20 = vmax.f32 %v813_v16, 0.0 }
 0x276   :  { %v827_v22 = vmax.f32 %v811_v18, 0.0 }
 0x277   :  { %v840_v23 = vpack.c.bf16 %v829_v20, %v828_v19 }
 0x278   :  { %v839_v24 = vpack.c.bf16 %v827_v22, %v826_v21  ;;  %v1085_v25 = vpop.f32.mrb[24].mxu0 }
 0x279   :  { %v816_v26 = vadd.f32 %v1085_v25, %v961_v46  ;;  %v780_v27 = vpop.f32.mrb[25].mxu0  ;;  %v862_v45 = vsel %vm540_vm4, %v840_v23, 0 }
 0x27a   :  { %v814_v28 = vadd.f32 %v961_v46, %v780_v27  ;;  %v1086_v29 = vpop.f32.mrb[26].mxu0  ;;  %v859_v44 = vsel %vm540_vm4, %v839_v24, 0 }
 0x27b   :  { %v817_v31 = vadd.f32 %v1086_v29, %v961_v46  ;;  %v783_v32 = vpop.f32.mrb[27].mxu0  ;;  %1092 = vmatpush3.bf16.xpose.msra.mxu1 %v853_v30  ;;  %v832_v34 = vmax.f32 %v816_v26, 0.0 }
 0x27c   :  { %v815_v33 = vadd.f32 %v961_v46, %v783_v32  ;;  %1093 = vmatprep.subr.bf16.mxu1 %v1141_v42  ;;  %v830_v38 = vmax.f32 %v814_v28, 0.0 }
 0x27d   :  { %v833_v36 = vmax.f32 %v817_v31, 0.0 }
 0x27e   :  { %v831_v39 = vmax.f32 %v815_v33, 0.0 }
 0x27f   :  { %v842_v40 = vpack.c.bf16 %v833_v36, %v832_v34 }
 0x280   :  { %v841_v41 = vpack.c.bf16 %v831_v39, %v830_v38 }
 0x281   :  { %v868_v47 = vsel %vm540_vm4, %v842_v40, 0 }
 0x282   :  { %v865_v46 = vsel %vm540_vm4, %v841_v41, 0 }
 0x283   :  { %1094 = vmatpush3.bf16.xpose.msra.mxu1 %v856_v43 }
 0x284   :  { %1095 = vmatprep.subr.bf16.mxu1 %v1141_v42 }
 0x28b   :  { %1096 = vmatpush3.bf16.xpose.msra.mxu1 %v859_v44 }
 0x28c   :  { %1097 = vmatprep.subr.bf16.mxu1 %v1141_v42 }
 0x293   :  { %1098 = vmatpush3.bf16.xpose.msra.mxu1 %v862_v45 }
 0x294   :  { %1099 = vmatprep.subr.bf16.mxu1 %v1141_v42 }
 0x29b   :  { %1100 = vmatpush3.bf16.xpose.msra.mxu1 %v865_v46 }
 0x29c   :  { %1101 = vmatprep.subr.bf16.mxu1 %v1141_v42 }
 0x2a3   :  { %1102 = vmatpush3.bf16.xpose.msra.mxu1 %v868_v47 }
 0x2aa   :  { %1104 = vmatmul.mubr.msk.bf16.vlgmr.msra.gmra.mrb[20].mxu1 %vm540_vm4, %v834_v48 }
 0x37d   :  { %v904_v35 = vpop.f32.mrb[20].mxu1 }
 0x37e   :  { %v911_v50 = vadd.f32 %v910_v49, %v904_v35  ;;  %v1105_v51 = vpop.f32.mrb[21].mxu1 }
 0x37f   :  { %v907_v52 = vpop.f32.mrb[22].mxu1 }
 0x380   :  { %v963_v53 = vmul.f32 -1.442695, %v911_v50  ;;  %v1106_v54 = vpop.f32.mrb[23].mxu1 }
 0x382   :  { %1136 = vpow2.f32 %v963_v53 }
 0x38c   :  { %v1137_v42 = vpop.eup %1136 }
 0x38d   :  { %v915_v55 = vadd.f32 1.0, %v1137_v42 }
 0x38f   :  { %1138 = vrcp.f32 %v915_v55 }
 0x399   :  { %v1139_v56 = vpop.eup %1138 }
 0x39a   :  { %918 = vst [vmem:[%s1467_s9] sm:$0x1] %v1139_v56 }

</bundles_post_ra>
